<compile_context>
chip_gen: v7x
topology: tpu7x:2x2x1
jax: 0.10.0
libtpu: 0.0.40
codegen_flags: <defaults>
</compile_context>

<pallas_src>
import jax
import jax.numpy as jnp
from jax import lax
from jax.experimental import pallas as pl
from jax.experimental.pallas import tpu as pltpu

_LANE = 128
_CHUNK_ROWS = 512          # in-kernel sub-chunk: 512*128*4B = 256 KiB f32 temporaries
_TILE_BYTES = 4 << 20      # HBM block bytes per operand per grid step


def _sublane_granule(dtype) -> int:
    itemsize = jnp.dtype(dtype).itemsize
    if itemsize >= 4:
        return 8
    return 8 * (4 // itemsize)      # 16 for bf16/f16, 32 for int8/fp8


def _make_kernel(*, tile_m, n_inner, n_outer, last_valid):
    """Grid: (batch, outer_chunk, inner_tile).  Scratch: VMEM (2, 8, 128) f32."""
    needs_mask = last_valid != tile_m
    n_full = tile_m // _CHUNK_ROWS
    rem_rows = tile_m - n_full * _CHUNK_ROWS

    def kernel(pred_ref, target_ref, iand_ref, isum_ref, acc_ref):
        o = pl.program_id(1)
        j = pl.program_id(2)

        # Reset the per-(batch, outer) vector accumulators at the start of the
        # inner reduction loop.
        @pl.when(j == 0)
        def _():
            acc_ref[...] = jnp.zeros_like(acc_ref)

        if needs_mask:
            is_last = jnp.logical_and(o == n_outer - 1, j == n_inner - 1)
            valid_rows = jnp.where(is_last, last_valid, tile_m).astype(jnp.int32)

        def chunk_sums(row0, rows, row_ids):
            p = pred_ref[0, pl.ds(row0, rows), :].astype(jnp.float32)
            t = target_ref[0, pl.ds(row0, rows), :].astype(jnp.float32)
            if needs_mask:
                keep = (row_ids + row0) < valid_rows
                p = jnp.where(keep, p, 0.0)
                t = jnp.where(keep, t, 0.0)
            # Sublane-aligned partial reduce to one (8, 128) vreg (VALU adds only).
            c0 = jnp.sum((t * p).reshape(-1, 8, _LANE), axis=0)   # intersection
            c1 = jnp.sum((t + p).reshape(-1, 8, _LANE), axis=0)   # sum_t + sum_p
            return c0, c1

        a0 = jnp.zeros((8, _LANE), jnp.float32)
        a1 = jnp.zeros((8, _LANE), jnp.float32)

        if n_full > 0:
            ids = (lax.broadcasted_iota(jnp.int32, (_CHUNK_ROWS, _LANE), 0)
                   if needs_mask else None)

            def body(c, carry):
                b0, b1 = carry
                row0 = pl.multiple_of(c * _CHUNK_ROWS, _CHUNK_ROWS)
                c0, c1 = chunk_sums(row0, _CHUNK_ROWS, ids)
                return b0 + c0, b1 + c1

            a0, a1 = lax.fori_loop(0, n_full, body, (a0, a1))

        if rem_rows > 0:
            ids = (lax.broadcasted_iota(jnp.int32, (rem_rows, _LANE), 0)
                   if needs_mask else None)
            c0, c1 = chunk_sums(n_full * _CHUNK_ROWS, rem_rows, ids)
            a0 = a0 + c0
            a1 = a1 + c1

        acc_ref[0] += a0
        acc_ref[1] += a1

        # Single cross-lane reduce + output write per (batch, outer) group.
        @pl.when(j == n_inner - 1)
        def _():
            iand_ref[...] = jnp.zeros_like(iand_ref) + jnp.sum(acc_ref[0])
            isum_ref[...] = jnp.zeros_like(isum_ref) + jnp.sum(acc_ref[1])

    return kernel


def iou_loss(pred, target):
    """Pallas implementation of IoU_loss.forward(pred, target) -> scalar."""
    assert pred.shape == target.shape
    B = pred.shape[0]
    N = 1
    for d in pred.shape[1:]:
        N *= d

    granule = max(_sublane_granule(pred.dtype), _sublane_granule(target.dtype))
    itemsize = max(jnp.dtype(pred.dtype).itemsize, jnp.dtype(target.dtype).itemsize)

    # Rows of 128 lanes.  Pad only when C*H*W is not 128-aligned (or smaller than
    # one sublane tile); the padded zeros are inert for both sums.
    m_rows = max(pl.cdiv(N, _LANE), granule)
    pad = m_rows * _LANE - N

    # Block rows: as many as fit the byte budget, multiple of the dtype granule,
    # never exceeding the array (so only the last block is partial).
    cap = max(granule, (_TILE_BYTES // (_LANE * itemsize)) // granule * granule)
    tile_m = min(cap, (m_rows // granule) * granule)

    n_tiles = pl.cdiv(m_rows, tile_m)
    # Spatial split so B==1 / odd-B calls still fill both v7x TensorCores.
    n_outer = 2 if (B % 2 == 1 and n_tiles >= 2 and n_tiles % 2 == 0) else 1
    n_inner = n_tiles // n_outer
    last_valid = m_rows - (n_tiles - 1) * tile_m   # valid rows in the final tile

    def _prep(x):
        x = x.reshape(B, N)
        if pad:
            # TODO(synk): only hit for non-128-aligned C*H*W; XLA pad costs one
            # extra HBM copy of the tensor (unavoidable for the lane-dense view).
            x = jnp.pad(x, ((0, 0), (0, pad)))
        return x.reshape(B, m_rows, _LANE)

    p3 = _prep(pred)
    t3 = _prep(target)

    in_map = lambda b, o, j: (b, o * n_inner + j, 0)
    out_map = lambda b, o, j: (b, o, 0, 0)

    kernel = _make_kernel(tile_m=tile_m, n_inner=n_inner, n_outer=n_outer,
                          last_valid=last_valid)

    block_in_bytes = tile_m * _LANE * (jnp.dtype(pred.dtype).itemsize
                                       + jnp.dtype(target.dtype).itemsize)
    # 2 operands x 2 buffers + headroom for chunk temporaries / accumulators.
    vmem_limit = min(48 << 20, max(16 << 20, 2 * block_in_bytes + (8 << 20)))

    iand_p, isum_p = pl.pallas_call(
        kernel,
        out_shape=(
            jax.ShapeDtypeStruct((B, n_outer, 1, 1), jnp.float32),
            jax.ShapeDtypeStruct((B, n_outer, 1, 1), jnp.float32),
        ),
        grid_spec=pltpu.PrefetchScalarGridSpec(
            num_scalar_prefetch=0,
            grid=(B, n_outer, n_inner),
            in_specs=[
                pl.BlockSpec((1, tile_m, _LANE), in_map),
                pl.BlockSpec((1, tile_m, _LANE), in_map),
            ],
            out_specs=[
                pl.BlockSpec((1, 1, 1, 1), out_map),
                pl.BlockSpec((1, 1, 1, 1), out_map),
            ],
            scratch_shapes=[pltpu.VMEM((2, 8, _LANE), jnp.float32)],
        ),
        compiler_params=pltpu.CompilerParams(
            dimension_semantics=("parallel", "parallel", "arbitrary"),
            vmem_limit_bytes=vmem_limit,
        ),
        cost_estimate=pl.CostEstimate(
            flops=3 * B * N,
            transcendentals=0,
            bytes_accessed=B * N * (jnp.dtype(pred.dtype).itemsize
                                    + jnp.dtype(target.dtype).itemsize),
        ),
    )(p3, t3)

    # Combine the per-(batch, outer) partials and finalize the loss (tiny).
    iand_b = jnp.sum(iand_p.reshape(B, n_outer), axis=1)
    isum_b = jnp.sum(isum_p.reshape(B, n_outer), axis=1)
    ior_b = isum_b - iand_b
    iou_b = iand_b / (ior_b + jnp.float32(1e-05))
    return jnp.sum(jnp.float32(1.0) - iou_b) / jnp.float32(B)


def iou_loss_ref(pred, target):
    """Pure-JAX reference matching the PyTorch loop semantics."""
    b = pred.shape[0]
    pred = pred.astype(jnp.float32)
    target = target.astype(jnp.float32)
    iand = jnp.sum(target * pred, axis=(1, 2, 3))
    ior = jnp.sum(target, axis=(1, 2, 3)) + jnp.sum(pred, axis=(1, 2, 3)) - iand
    iou1 = iand / (ior + 1e-05)
    return jnp.sum(1.0 - iou1) / b


if __name__ == "__main__":
    key = jax.random.PRNGKey(0)
    k1, k2 = jax.random.split(key)
    B, C, H, W = 2, 4, 16, 16
    pred = jax.nn.sigmoid(jax.random.normal(k1, (B, C, H, W), dtype=jnp.float32))
    target = (jax.random.uniform(k2, (B, C, H, W)) > 0.5).astype(jnp.float32)

    out = jax.block_until_ready(jax.jit(iou_loss)(pred, target))
    ref = jax.block_until_ready(iou_loss_ref(pred, target))

    assert jnp.allclose(out, ref, rtol=1e-5, atol=1e-5), (out, ref)
    print("KERNEL_OK")
</pallas_src>

<mosaic_0001>
module attributes {stable_mosaic.version = 11 : i64} {
  func.func @kernel(%arg0: i32, %arg1: i32, %arg2: i32, %arg3: memref<1x8x128xf32, #tpu.memory_space<vmem>>, %arg4: memref<1x8x128xf32, #tpu.memory_space<vmem>>, %arg5: memref<1x1x1x1xf32, #tpu.memory_space<vmem>>, %arg6: memref<1x1x1x1xf32, #tpu.memory_space<vmem>>, %arg7: memref<2x8x128xf32, #tpu.memory_space<vmem>>) attributes {dimension_semantics = [#tpu.dimension_semantics<parallel>, #tpu.dimension_semantics<parallel>, #tpu.dimension_semantics<arbitrary>], iteration_bounds = array<i64: 2, 1, 1>, scalar_prefetch = 0 : i64, scratch_operands = 1 : i64, tpu.core_type = #tpu.core_type<tc>, window_params = [{transform_indices = @transform_0, window_bounds = array<i64: 1, 8, 128>}, {transform_indices = @transform_1, window_bounds = array<i64: 1, 8, 128>}, {transform_indices = @transform_2, window_bounds = array<i64: 1, 1, 1, 1>}, {transform_indices = @transform_3, window_bounds = array<i64: 1, 1, 1, 1>}]} {
    %c0_i32 = arith.constant 0 : i32
    %0 = arith.cmpi eq, %arg2, %c0_i32 : i32
    %1 = arith.extui %0 : i1 to i32
    %c0_i32_0 = arith.constant 0 : i32
    %2 = arith.cmpi ne, %1, %c0_i32_0 : i32
    scf.if %2 {
      %cst_22 = arith.constant 0.000000e+00 : f32
      %32 = vector.broadcast %cst_22 : f32 to vector<2x8x128xf32>
      %c0_23 = arith.constant 0 : index
      %c0_24 = arith.constant 0 : index
      %c0_25 = arith.constant 0 : index
      %33 = vector.load %arg7[%c0_23, %c0_24, %c0_25] : memref<2x8x128xf32, #tpu.memory_space<vmem>>, vector<2x8x128xf32>
      tpu.vector_store %arg7[%c0_23, %c0_24, %c0_25], %32 {strides = array<i32>} : memref<2x8x128xf32, #tpu.memory_space<vmem>>, vector<2x8x128xf32>,
    } else {
    }
    %cst = arith.constant 0.000000e+00 : f32
    %3 = vector.broadcast %cst : f32 to vector<8x128xf32>
    %cst_1 = arith.constant 0.000000e+00 : f32
    %4 = vector.broadcast %cst_1 : f32 to vector<8x128xf32>
    %c0 = arith.constant 0 : index
    %c0_2 = arith.constant 0 : index
    %c0_3 = arith.constant 0 : index
    %5 = vector.load %arg3[%c0, %c0_2, %c0_3] : memref<1x8x128xf32, #tpu.memory_space<vmem>>, vector<1x8x128xf32>
    %6 = vector.shape_cast %5 : vector<1x8x128xf32> to vector<8x128xf32>
    %c0_4 = arith.constant 0 : index
    %c0_5 = arith.constant 0 : index
    %c0_6 = arith.constant 0 : index
    %7 = vector.load %arg4[%c0_4, %c0_5, %c0_6] : memref<1x8x128xf32, #tpu.memory_space<vmem>>, vector<1x8x128xf32>
    %8 = vector.shape_cast %7 : vector<1x8x128xf32> to vector<8x128xf32>
    %9 = arith.mulf %8, %6 : vector<8x128xf32>
    %10 = vector.shape_cast %9 : vector<8x128xf32> to vector<1x8x128xf32>
    %cst_7 = arith.constant dense<0.000000e+00> : vector<8x128xf32>
    %11 = vector.multi_reduction <add>, %10, %cst_7 [0] : vector<1x8x128xf32> to vector<8x128xf32>
    %12 = arith.addf %8, %6 : vector<8x128xf32>
    %13 = vector.shape_cast %12 : vector<8x128xf32> to vector<1x8x128xf32>
    %cst_8 = arith.constant dense<0.000000e+00> : vector<8x128xf32>
    %14 = vector.multi_reduction <add>, %13, %cst_8 [0] : vector<1x8x128xf32> to vector<8x128xf32>
    %15 = arith.addf %3, %11 : vector<8x128xf32>
    %16 = arith.addf %4, %14 : vector<8x128xf32>
    %c0_9 = arith.constant 0 : index
    %c0_10 = arith.constant 0 : index
    %c0_11 = arith.constant 0 : index
    %17 = vector.load %arg7[%c0_9, %c0_10, %c0_11] : memref<2x8x128xf32, #tpu.memory_space<vmem>>, vector<1x8x128xf32>
    %18 = vector.shape_cast %17 : vector<1x8x128xf32> to vector<8x128xf32>
    %19 = arith.addf %18, %15 : vector<8x128xf32>
    %c0_12 = arith.constant 0 : index
    %c0_13 = arith.constant 0 : index
    %c0_14 = arith.constant 0 : index
    %20 = vector.load %arg7[%c0_12, %c0_13, %c0_14] : memref<2x8x128xf32, #tpu.memory_space<vmem>>, vector<1x8x128xf32>
    %21 = vector.shape_cast %20 : vector<1x8x128xf32> to vector<8x128xf32>
    %22 = vector.shape_cast %19 : vector<8x128xf32> to vector<1x8x128xf32>
    tpu.vector_store %arg7[%c0_12, %c0_13, %c0_14], %22 {strides = array<i32>} : memref<2x8x128xf32, #tpu.memory_space<vmem>>, vector<1x8x128xf32>,
    %c1 = arith.constant 1 : index
    %c0_15 = arith.constant 0 : index
    %c0_16 = arith.constant 0 : index
    %23 = vector.load %arg7[%c1, %c0_15, %c0_16] : memref<2x8x128xf32, #tpu.memory_space<vmem>>, vector<1x8x128xf32>
    %24 = vector.shape_cast %23 : vector<1x8x128xf32> to vector<8x128xf32>
    %25 = arith.addf %24, %16 : vector<8x128xf32>
    %c1_17 = arith.constant 1 : index
    %c0_18 = arith.constant 0 : index
    %c0_19 = arith.constant 0 : index
    %26 = vector.load %arg7[%c1_17, %c0_18, %c0_19] : memref<2x8x128xf32, #tpu.memory_space<vmem>>, vector<1x8x128xf32>
    %27 = vector.shape_cast %26 : vector<1x8x128xf32> to vector<8x128xf32>
    %28 = vector.shape_cast %25 : vector<8x128xf32> to vector<1x8x128xf32>
    tpu.vector_store %arg7[%c1_17, %c0_18, %c0_19], %28 {strides = array<i32>} : memref<2x8x128xf32, #tpu.memory_space<vmem>>, vector<1x8x128xf32>,
    %c0_i32_20 = arith.constant 0 : i32
    %29 = arith.cmpi eq, %arg2, %c0_i32_20 : i32
    %30 = arith.extui %29 : i1 to i32
    %c0_i32_21 = arith.constant 0 : i32
    %31 = arith.cmpi ne, %30, %c0_i32_21 : i32
    scf.if %31 {
      %cst_22 = arith.constant 0.000000e+00 : f32
      %32 = vector.broadcast %cst_22 : f32 to vector<1x1x1x1xf32>
      %c0_23 = arith.constant 0 : index
      %c0_24 = arith.constant 0 : index
      %c0_25 = arith.constant 0 : index
      %33 = vector.load %arg7[%c0_23, %c0_24, %c0_25] : memref<2x8x128xf32, #tpu.memory_space<vmem>>, vector<1x8x128xf32>
      %34 = vector.shape_cast %33 : vector<1x8x128xf32> to vector<8x128xf32>
      %35 = vector.shape_cast %34 : vector<8x128xf32> to vector<1x8x128xf32>
      %cst_26 = arith.constant dense<0.000000e+00> : vector<1xf32>
      %36 = vector.multi_reduction <add>, %35, %cst_26 [1, 2] : vector<1x8x128xf32> to vector<1xf32>
      %37 = vector.shape_cast %36 : vector<1xf32> to vector<1x1x1xf32>
      %38 = vector.extract %37[0, 0, 0] : f32 from vector<1x1x1xf32>
      %39 = vector.broadcast %38 : f32 to vector<1x1x1x1xf32>
      %40 = arith.addf %32, %39 : vector<1x1x1x1xf32>
      %c0_27 = arith.constant 0 : index
      %c0_28 = arith.constant 0 : index
      %c0_29 = arith.constant 0 : index
      %c0_30 = arith.constant 0 : index
      %41 = vector.load %arg5[%c0_27, %c0_28, %c0_29, %c0_30] : memref<1x1x1x1xf32, #tpu.memory_space<vmem>>, vector<1x1x1x1xf32>
      tpu.vector_store %arg5[%c0_27, %c0_28, %c0_29, %c0_30], %40 {strides = array<i32>} : memref<1x1x1x1xf32, #tpu.memory_space<vmem>>, vector<1x1x1x1xf32>,
      %cst_31 = arith.constant 0.000000e+00 : f32
      %42 = vector.broadcast %cst_31 : f32 to vector<1x1x1x1xf32>
      %c1_32 = arith.constant 1 : index
      %c0_33 = arith.constant 0 : index
      %c0_34 = arith.constant 0 : index
      %43 = vector.load %arg7[%c1_32, %c0_33, %c0_34] : memref<2x8x128xf32, #tpu.memory_space<vmem>>, vector<1x8x128xf32>
      %44 = vector.shape_cast %43 : vector<1x8x128xf32> to vector<8x128xf32>
      %45 = vector.shape_cast %44 : vector<8x128xf32> to vector<1x8x128xf32>
      %cst_35 = arith.constant dense<0.000000e+00> : vector<1xf32>
      %46 = vector.multi_reduction <add>, %45, %cst_35 [1, 2] : vector<1x8x128xf32> to vector<1xf32>
      %47 = vector.shape_cast %46 : vector<1xf32> to vector<1x1x1xf32>
      %48 = vector.extract %47[0, 0, 0] : f32 from vector<1x1x1xf32>
      %49 = vector.broadcast %48 : f32 to vector<1x1x1x1xf32>
      %50 = arith.addf %42, %49 : vector<1x1x1x1xf32>
      %c0_36 = arith.constant 0 : index
      %c0_37 = arith.constant 0 : index
      %c0_38 = arith.constant 0 : index
      %c0_39 = arith.constant 0 : index
      %51 = vector.load %arg6[%c0_36, %c0_37, %c0_38, %c0_39] : memref<1x1x1x1xf32, #tpu.memory_space<vmem>>, vector<1x1x1x1xf32>
      tpu.vector_store %arg6[%c0_36, %c0_37, %c0_38, %c0_39], %50 {strides = array<i32>} : memref<1x1x1x1xf32, #tpu.memory_space<vmem>>, vector<1x1x1x1xf32>,
    } else {
    }
    return
  }
  func.func @transform_0(%arg0: i32, %arg1: i32, %arg2: i32) -> (i32, i32, i32) {
    %c1_i32 = arith.constant 1 : i32
    %0 = arith.muli %arg1, %c1_i32 : i32
    %1 = arith.addi %0, %arg2 : i32
    %c0_i32 = arith.constant 0 : i32
    %c0_i32_0 = arith.constant 0 : i32
    return %arg0, %1, %c0_i32 : i32, i32, i32
  }
  func.func @transform_1(%arg0: i32, %arg1: i32, %arg2: i32) -> (i32, i32, i32) {
    %c1_i32 = arith.constant 1 : i32
    %0 = arith.muli %arg1, %c1_i32 : i32
    %1 = arith.addi %0, %arg2 : i32
    %c0_i32 = arith.constant 0 : i32
    %c0_i32_0 = arith.constant 0 : i32
    return %arg0, %1, %c0_i32 : i32, i32, i32
  }
  func.func @transform_2(%arg0: i32, %arg1: i32, %arg2: i32) -> (i32, i32, i32, i32) {
    %c0_i32 = arith.constant 0 : i32
    %c0_i32_0 = arith.constant 0 : i32
    %c0_i32_1 = arith.constant 0 : i32
    return %arg0, %arg1, %c0_i32, %c0_i32_0 : i32, i32, i32, i32
  }
  func.func @transform_3(%arg0: i32, %arg1: i32, %arg2: i32) -> (i32, i32, i32, i32) {
    %c0_i32 = arith.constant 0 : i32
    %c0_i32_0 = arith.constant 0 : i32
    %c0_i32_1 = arith.constant 0 : i32
    return %arg0, %arg1, %c0_i32, %c0_i32_0 : i32, i32, i32, i32
  }
}

</mosaic_0001>

<bundles_post_ra>
// kernel: iou_loss.1
= control target key start
LH: loop header
LB: loop body
LE: loop exit
PB: predicated region body
PF: predicated region fallthrough
CT: control target
= control target key end

     0   :  { %s514_s12 = smov 0   ;;  %s516_s13 = smov 0   ;;  %s558_s0 = inlined_call_operand.vmem [shape: f32[2,8,128], index: 0, kind: input, shape index: {}]   ;;  %s559_s1 = inlined_call_operand.vmem [shape: f32[2,8,128], index: 1, kind: input, shape index: {}]   ;;  %s560_s2 = inlined_call_operand.vmem [shape: f32[2,1,1,1], index: 2, kind: output, shape index: {0}]   ;;  %s561_s3 = inlined_call_operand.vmem [shape: f32[2,1,1,1], index: 3, kind: output, shape index: {1}]  }
   0x1   :  { %s518_s14 = smov 0  }
   0x2 LB: > { %s33_s15 = sadd.s32 1, %s488_s13  ;;  %p437_p0 = scmp.ge.s32.totalorder %s492_s14, 1  ;;  %s492_s14 = sphi %s518_s14, %s14_s14   ;;  %s488_s13 = sphi %s516_s13, %s563_s13   ;;  %s484_s12 = sphi %s514_s12, %s562_s12  }
   0x3   : > { %p35_p1 = scmp.ge.s32.totalorder %s33_s15, 2  ;;  %p189_p2 = scmp.lt.s32.totalorder %s492_s14, 3 }
   0x5   : > { %s565_s15 = smov (%p35_p1, %s33_s15), 0  ;;  %p190_p3 = pnand %p437_p0, %p189_p2 }
   0x6   : > { %p232_p4 = scmp.lt.s32.totalorder (!%p190_p3), %s484_s12, 1  ;;  %vm297_vm0 = vcmask (!%p190_p3), 0  }
   0x7   : > { %193 = sbr.rel (%p190_p3) target bundleno = 231 (0xe7), region = 28 }
   0xe   : > { %s567_s12 = smov (!%p232_p4, %s484_s12), 1 }
   0xf   : > { %s438_s16 = sshll.u32 %s567_s12, 3  ;;  %s254_s25 = scalar_lea.vmem %s560_s2, %s567_s12 }
  0x10   : > { %s238_s19 = scalar_lea.vmem %s558_s0, %s438_s16  ;;  %s247_s22 = scalar_lea.vmem %s559_s1, %s438_s16 }
  0x11   : > { %v267_v0 = vld [vmem:[%s238_s19] sm:$0xff]  ;;  %s260_s29 = scalar_lea.vmem %s561_s3, %s567_s12 }
  0x12   : > { %v268_v1 = vld [vmem:[%s247_s22] sm:$0xff] }
  0x13   : > { %v269_v2 = vmul.f32 %v268_v1, %v267_v0  ;;  %v271_v3 = vadd.f32 %v268_v1, %v267_v0 }
  0x15   : > { %286 = vadd.xlane.f32.xlu0 %v269_v2 }
  0x19   : > { %300 = vadd.xlane.f32.xlu0 %v271_v3 }
  0xa2   : > { %v287_v4 = vpop.xlane.xlu0 %286 }
  0xa3   : > { %v288_v5 = vrot.slane %v287_v4, 4 }
  0xa5   : > { %v289_v6 = vadd.f32 %v288_v5, %v287_v4 }
  0xa6   : > { %v301_v7 = vpop.xlane.xlu0 %300 }
  0xa7   : > { %v290_v8 = vrot.slane %v289_v6, 2  ;;  %v302_v9 = vrot.slane %v301_v7, 4 }
  0xa9   : > { %v303_v10 = vadd.f32 %v302_v9, %v301_v7  ;;  %v291_v11 = vadd.f32 %v290_v8, %v289_v6 }
  0xab   : > { %v304_v12 = vrot.slane %v303_v10, 2  ;;  %v292_v13 = vrot.slane %v291_v11, 1 }
  0xad   : > { %v305_v14 = vadd.f32 %v304_v12, %v303_v10  ;;  %v293_v15 = vadd.f32 %v292_v13, %v291_v11 }
  0xaf   : > { %442 = vpush %v293_v15  ;;  %v306_v16 = vrot.slane %v305_v14, 1 }
  0xb1   : > { %v307_v17 = vadd.f32 %v306_v16, %v305_v14 }
  0xb3   : > { %444 = vpush %v307_v17 }
  0xe0   : > { %s443_s26 = spop %442 }
  0xe1   : > { %v295_v18 = vstv %s443_s26 }
  0xe2   : > { %298 = vst.msk [vmem:[%s254_s25] sm:$0x1] %vm297_vm0, %v295_v18 }
  0xe4   : > { %s445_s30 = spop %444 }
  0xe5   : > { %v309_v19 = vstv %s445_s30 }
  0xe6   : > { %311 = vst.msk [vmem:[%s260_s29] sm:$0x1] %vm297_vm0, %v309_v19 }
  0xe7 PF: > { %s14_s14 = sadd.s32 1, %s492_s14   ;;  %s562_s12 = smov %s488_s13 }
  0xe8   : > { %p11_p5 = scmp.ge.s32.totalorder %s14_s14, 4   ;;  %s563_s13 = smov %s565_s15 }
  0xea   :  { %13 = sbr.rel (!%p11_p5) target bundleno = 2 (0x2), region = 82 }

</bundles_post_ra>
